<compile_context>
chip_gen: v7x
topology: tpu7x:2x2x1
jax: 0.10.0
libtpu: 0.0.40
codegen_flags: <defaults>
</compile_context>

<pallas_src>
import functools

import jax
import jax.numpy as jnp
from jax.experimental import pallas as pl
from jax.experimental.pallas import tpu as pltpu


def _round_up(x, m):
    return ((x + m - 1) // m) * m


def mlp_kernel(x_ref, w1_ref, b1_ref, w2_ref, b2_ref, o_ref):
    # Hidden layer: (tm, F) f32 @ (F, H) f32 -> f32 on the MXU, bias + tanh on
    # VPU/EUP. Weights/biases are whole-array VMEM-resident blocks (constant
    # index_map), so no per-step HBM traffic for them.
    h = jnp.tanh(
        jnp.dot(x_ref[...], w1_ref[...], preferred_element_type=jnp.float32)
        + b1_ref[...]
    )
    # Output layer: K=64, N=D is tiny; MXU cycles are irrelevant next to DMA,
    # so stay in f32 (no extra quantization of the hidden activations).
    o_ref[...] = (
        jnp.dot(h, w2_ref[...], preferred_element_type=jnp.float32) + b2_ref[...]
    ).astype(o_ref.dtype)


@functools.partial(
    jax.jit, static_argnames=("block_rows", "small_batch_threshold")
)
def network_forward(x, w1, b1, w2, b2, *, block_rows=8192,
                    small_batch_threshold=256):
    """Pallas TPU forward pass of Network: Linear(F,64) -> Tanh -> Linear(64,D).

    x : (B, F)  float32
    w1: (F, 64) float32, b1: (1, 64) float32
    w2: (64, D) float32, b2: (1, D) float32
    returns (B, D) float32
    """
    B, F = x.shape
    H = w1.shape[1]
    D = w2.shape[1]

    # Small-batch fast path: at tiny B the work is a few KB of math and the
    # pallas_call fixed cost (grid setup, weight DMAs) dominates; a fused XLA
    # matmul chain is strictly faster and bit-compatible in spirit.
    if B < small_batch_threshold:
        return jnp.tanh(x @ w1 + b1) @ w2 + b2

    # Row tiling: big multiple-of-8 tiles amortize per-grid-step overhead, but
    # cap at ~half the batch so the grid has >= 2 steps and both v7x
    # TensorCores get work ("parallel" batch axis). Ragged last block is fine:
    # rows are independent and out-of-bounds output stores are masked.
    tm = min(block_rows, _round_up(max((B + 1) // 2, 8), 8))
    grid = (pl.cdiv(B, tm),)

    cost = pl.CostEstimate(
        flops=2 * B * (F * H + H * D),
        transcendentals=B * H,
        bytes_accessed=4 * (B * F + F * H + H + H * D + D + B * D),
    )

    return pl.pallas_call(
        mlp_kernel,
        out_shape=jax.ShapeDtypeStruct((B, D), jnp.float32),
        grid=grid,
        in_specs=[
            pl.BlockSpec((tm, F), lambda i: (i, 0)),   # x tile, pipelined over batch
            pl.BlockSpec((F, H), lambda i: (0, 0)),    # weights: VMEM-resident
            pl.BlockSpec((1, H), lambda i: (0, 0)),
            pl.BlockSpec((H, D), lambda i: (0, 0)),
            pl.BlockSpec((1, D), lambda i: (0, 0)),
        ],
        out_specs=pl.BlockSpec((tm, D), lambda i: (i, 0)),  # D == full dim -> legal
        compiler_params=pltpu.CompilerParams(
            dimension_semantics=("parallel",),         # batch rows are independent
        ),
        cost_estimate=cost,
    )(x, w1, b1, w2, b2)


def init_params(key, in_features, hidden, output_dim):
    """Deterministic init mimicking torch.nn.Linear default (uniform ±1/sqrt(fan_in))."""
    k1, k2, k3, k4 = jax.random.split(key, 4)
    bound1 = 1.0 / jnp.sqrt(jnp.float32(in_features))
    bound2 = 1.0 / jnp.sqrt(jnp.float32(hidden))
    w1 = jax.random.uniform(k1, (in_features, hidden), jnp.float32, -bound1, bound1)
    b1 = jax.random.uniform(k2, (1, hidden), jnp.float32, -bound1, bound1)
    w2 = jax.random.uniform(k3, (hidden, output_dim), jnp.float32, -bound2, bound2)
    b2 = jax.random.uniform(k4, (1, output_dim), jnp.float32, -bound2, bound2)
    return w1, b1, w2, b2


if __name__ == "__main__":
    key = jax.random.PRNGKey(0)
    kx1, kx2, kp = jax.random.split(key, 3)

    # Network(input_shape=(4, 8), output_dim=4): in_features = prod(input_shape) = 32
    in_features = 32
    hidden = 64
    output_dim = 4

    w1, b1, w2, b2 = init_params(kp, in_features, hidden, output_dim)

    def ref_fwd(x):
        return jnp.tanh(x @ w1 + b1) @ w2 + b2

    # 1) Batch large enough to exercise the Pallas kernel path (non-divisible
    #    by the tile -> also exercises the ragged/masked last block).
    batch_large = 500
    x_large = jax.random.normal(kx1, (batch_large, in_features), jnp.float32)
    out_large = network_forward(x_large, w1, b1, w2, b2)
    jax.block_until_ready(out_large)
    assert out_large.shape == (batch_large, output_dim)
    assert jnp.allclose(out_large, ref_fwd(x_large), atol=1e-2, rtol=1e-2)

    # 2) The tiny test case from the module spec goes through the fast path.
    batch_small = 2
    x_small = jax.random.normal(kx2, (batch_small, in_features), jnp.float32)
    out_small = network_forward(x_small, w1, b1, w2, b2)
    jax.block_until_ready(out_small)
    assert out_small.shape == (batch_small, output_dim)
    assert jnp.allclose(out_small, ref_fwd(x_small), atol=1e-2, rtol=1e-2)

    print("KERNEL_OK")
</pallas_src>

<mosaic_0001>
module attributes {stable_mosaic.version = 11 : i64} {
  func.func @mlp_kernel(%arg0: i32, %arg1: memref<256x32xf32, #tpu.memory_space<vmem>>, %arg2: memref<32x64xf32, #tpu.memory_space<vmem>>, %arg3: memref<1x64xf32, #tpu.memory_space<vmem>>, %arg4: memref<64x4xf32, #tpu.memory_space<vmem>>, %arg5: memref<1x4xf32, #tpu.memory_space<vmem>>, %arg6: memref<256x4xf32, #tpu.memory_space<vmem>>) attributes {dimension_semantics = [#tpu.dimension_semantics<parallel>], iteration_bounds = array<i64: 2>, scalar_prefetch = 0 : i64, scratch_operands = 0 : i64, tpu.core_type = #tpu.core_type<tc>, window_params = [{transform_indices = @transform_0, window_bounds = array<i64: 256, 32>}, {pipeline_mode = #tpu.pipeline_mode<synchronous>, transform_indices = @transform_1, window_bounds = array<i64: 32, 64>}, {pipeline_mode = #tpu.pipeline_mode<synchronous>, transform_indices = @transform_2, window_bounds = array<i64: 1, 64>}, {pipeline_mode = #tpu.pipeline_mode<synchronous>, transform_indices = @transform_3, window_bounds = array<i64: 64, 4>}, {pipeline_mode = #tpu.pipeline_mode<synchronous>, transform_indices = @transform_4, window_bounds = array<i64: 1, 4>}, {transform_indices = @transform_5, window_bounds = array<i64: 256, 4>}]} {
    %c0 = arith.constant 0 : index
    %c0_0 = arith.constant 0 : index
    %0 = vector.load %arg1[%c0, %c0_0] : memref<256x32xf32, #tpu.memory_space<vmem>>, vector<256x32xf32>
    %c0_1 = arith.constant 0 : index
    %c0_2 = arith.constant 0 : index
    %1 = vector.load %arg2[%c0_1, %c0_2] : memref<32x64xf32, #tpu.memory_space<vmem>>, vector<32x64xf32>
    %cst = arith.constant dense<0.000000e+00> : vector<256x64xf32>
    %2 = tpu.matmul %0, %1, %cst {dimension_numbers = #tpu.dot_dimension_numbers<[1], [0], [0], [1], [0, 0, 1, 1], [], []>} : vector<256x32xf32>, vector<32x64xf32>, vector<256x64xf32> -> vector<256x64xf32>
    %c0_3 = arith.constant 0 : index
    %c0_4 = arith.constant 0 : index
    %3 = vector.load %arg3[%c0_3, %c0_4] : memref<1x64xf32, #tpu.memory_space<vmem>>, vector<1x64xf32>
    %4 = vector.broadcast %3 : vector<1x64xf32> to vector<256x64xf32>
    %5 = arith.addf %2, %4 : vector<256x64xf32>
    %6 = math.tanh %5 : vector<256x64xf32>
    %c0_5 = arith.constant 0 : index
    %c0_6 = arith.constant 0 : index
    %7 = vector.load %arg4[%c0_5, %c0_6] : memref<64x4xf32, #tpu.memory_space<vmem>>, vector<64x4xf32>
    %cst_7 = arith.constant dense<0.000000e+00> : vector<256x4xf32>
    %8 = tpu.matmul %6, %7, %cst_7 {dimension_numbers = #tpu.dot_dimension_numbers<[1], [0], [0], [1], [0, 0, 1, 1], [], []>} : vector<256x64xf32>, vector<64x4xf32>, vector<256x4xf32> -> vector<256x4xf32>
    %c0_8 = arith.constant 0 : index
    %c0_9 = arith.constant 0 : index
    %9 = vector.load %arg5[%c0_8, %c0_9] : memref<1x4xf32, #tpu.memory_space<vmem>>, vector<1x4xf32>
    %10 = vector.broadcast %9 : vector<1x4xf32> to vector<256x4xf32>
    %11 = arith.addf %8, %10 : vector<256x4xf32>
    %c0_10 = arith.constant 0 : index
    %c0_11 = arith.constant 0 : index
    %12 = vector.load %arg6[%c0_10, %c0_11] : memref<256x4xf32, #tpu.memory_space<vmem>>, vector<256x4xf32>
    tpu.vector_store %arg6[%c0_10, %c0_11], %11 {strides = array<i32>} : memref<256x4xf32, #tpu.memory_space<vmem>>, vector<256x4xf32>,
    return
  }
  func.func @transform_0(%arg0: i32) -> (i32, i32) {
    %c0_i32 = arith.constant 0 : i32
    %c0_i32_0 = arith.constant 0 : i32
    return %arg0, %c0_i32 : i32, i32
  }
  func.func @transform_1(%arg0: i32) -> (i32, i32) {
    %c0_i32 = arith.constant 0 : i32
    %c0_i32_0 = arith.constant 0 : i32
    %c0_i32_1 = arith.constant 0 : i32
    return %c0_i32, %c0_i32_0 : i32, i32
  }
  func.func @transform_2(%arg0: i32) -> (i32, i32) {
    %c0_i32 = arith.constant 0 : i32
    %c0_i32_0 = arith.constant 0 : i32
    %c0_i32_1 = arith.constant 0 : i32
    return %c0_i32, %c0_i32_0 : i32, i32
  }
  func.func @transform_3(%arg0: i32) -> (i32, i32) {
    %c0_i32 = arith.constant 0 : i32
    %c0_i32_0 = arith.constant 0 : i32
    %c0_i32_1 = arith.constant 0 : i32
    return %c0_i32, %c0_i32_0 : i32, i32
  }
  func.func @transform_4(%arg0: i32) -> (i32, i32) {
    %c0_i32 = arith.constant 0 : i32
    %c0_i32_0 = arith.constant 0 : i32
    %c0_i32_1 = arith.constant 0 : i32
    return %c0_i32, %c0_i32_0 : i32, i32
  }
  func.func @transform_5(%arg0: i32) -> (i32, i32) {
    %c0_i32 = arith.constant 0 : i32
    %c0_i32_0 = arith.constant 0 : i32
    return %arg0, %c0_i32 : i32, i32
  }
}

</mosaic_0001>

<bundles_post_ra>
// kernel: network_forward.1
= control target key start
LH: loop header
LB: loop body
LE: loop exit
PB: predicated region body
PF: predicated region fallthrough
CT: control target
= control target key end

     0   :  { %s1943_s18 = smov 0   ;;  %s1945_s19 = smov 0   ;;  %s2394_s0 = inlined_call_operand.vmem [shape: f32[500,32], index: 0, kind: input, shape index: {}]   ;;  %s2395_s1 = inlined_call_operand.vmem [shape: f32[32,64], index: 1, kind: input, shape index: {}]   ;;  %s2396_s2 = inlined_call_operand.vmem [shape: f32[1,64], index: 2, kind: input, shape index: {}]   ;;  %s2397_s3 = inlined_call_operand.vmem [shape: f32[64,4], index: 3, kind: input, shape index: {}]   ;;  %s2398_s4 = inlined_call_operand.vmem [shape: f32[1,4], index: 4, kind: input, shape index: {}]   ;;  %s2399_s5 = inlined_call_operand.vmem [shape: f32[500,4], index: 5, kind: output, shape index: {}]  }
   0x1   :  { %s1947_s20 = smov 0  }
   0x2 LB: > { %s1956_s21 = sadd.s32 4294967295, %s1879_s20   ;;  %s1958_s22 = sadd.s32 1, %s1879_s20   ;;  %s1879_s20 = sphi %s1947_s20, %s2408_s20   ;;  %s1875_s19 = sphi %s1945_s19, %s2407_s19   ;;  %s1871_s18 = sphi %s1943_s18, %s2406_s18  }
   0x3   : > { %s129_s23 = ssub.s32 %s1879_s20, %s1958_s22  ;;  %s132_s24 = sadd.s32 1, %s1875_s19 }
   0x4   : > { %p130_p0 = scmp.eq.s32.totalorder %s129_s23, 0  ;;  %p142_p1 = scmp.ne.s32.totalorder %s1875_s19, %s1871_s18 }
   0x5   : > { %p143_p2 = scmp.eq.s32.totalorder %s1956_s21, 1  ;;  %p1355_p3 = scmp.ge.s32.totalorder %s1879_s20, 1 }
   0x6   : > { %s1966_s25 = scalar_select %p130_p0, %s1875_s19, %s132_s24  }
   0x7   : > { %p1968_p4 = por %p143_p2, %p142_p1  ;;  %p196_p5 = scmp.lt.s32.totalorder %s1879_s20, 3 }
   0x9   : > { %p197_p6 = pnand %p1355_p3, %p196_p5 }
   0xa   : > { %v278_v0 = vld [vmem:[%s2395_s1] sm:$0xff] (!%p197_p6)  ;;  %v279_v1 = vld [vmem:[%s2395_s1 + $0x8] sm:$0xff] (!%p197_p6)  ;;  %v280_v2 = vld [vmem:[%s2395_s1 + $0x10] sm:$0xff] (!%p197_p6)  ;;  %s1982_s8 = sshll.u32 (!%p197_p6), %s1956_s21, 5  ;;  %vm289_vm0 = vcmask (!%p197_p6), 261120   ;;  %vm658_vm1 = vcmask (!%p197_p6), 523264  }
   0xb   : > { %200 = sbr.rel (%p197_p6) target bundleno = 583 (0x247), region = 40  ;;  %v1641_v3 = vpack.c.bf16 (!%p197_p6), %v279_v1, %v278_v0  ;;  %v281_v4 = vld [vmem:[%s2395_s1 + $0x18] sm:$0xff] (!%p197_p6)  ;;  %p232_p7 = scmp.lt.s32.totalorder (!%p197_p6), %s1982_s8, 62  ;;  %v643_v38 = vld [vmem:[%s2397_s3] sm:$0xff] (!%p197_p6)  ;;  %v644_v39 = vld [vmem:[%s2397_s3 + $0x8] sm:$0xff] (!%p197_p6)  ;;  %vm980_vm2 = vcmask (!%p197_p6), 31744  }
   0xc   : > { %v1645_v5 = vpack.c.bf16 (!%p197_p6), %v281_v4, %v280_v2  ;;  %v1649_v40 = vpack.c.bf16 (!%p197_p6), %v644_v39, %v643_v38  ;;  %v645_v41 = vld [vmem:[%s2397_s3 + $0x10] sm:$0xff] (!%p197_p6)  ;;  %v646_v42 = vld [vmem:[%s2397_s3 + $0x18] sm:$0xff] (!%p197_p6)  ;;  %v647_v44 = vld [vmem:[%s2397_s3 + $0x20] sm:$0xff] (!%p197_p6)  ;;  %s224_s16 = sand.u32 (!%p197_p6), 1, %s1871_s18  }
   0xd   : > { %1642 = vmatprep.subr.bf16.mxu0 (!%p197_p6), %v1641_v3  ;;  %v1653_v43 = vpack.c.bf16 (!%p197_p6), %v646_v42, %v645_v41  ;;  %v648_v45 = vld [vmem:[%s2397_s3 + $0x28] sm:$0xff] (!%p197_p6)  ;;  %v649_v47 = vld [vmem:[%s2397_s3 + $0x30] sm:$0xff] (!%p197_p6)  ;;  %v650_v48 = vld [vmem:[%s2397_s3 + $0x38] sm:$0xff] (!%p197_p6)  ;;  %s1356_s17 = sshll.u32 (!%p197_p6), %s224_s16, 8 }
   0xe   : > { %1644 = vmatpush3.bf16.msra.mxu0 (!%p197_p6), %v1641_v3  ;;  %1665 = vmatprep.subr.bf16.mxu1 (!%p197_p6), %v1649_v40  ;;  %v1657_v46 = vpack.c.bf16 (!%p197_p6), %v648_v45, %v647_v44  ;;  %v1661_v49 = vpack.c.bf16 (!%p197_p6), %v650_v48, %v649_v47  ;;  %v2085_v50 = vld [vmem:[%s2396_s2] ss:$0 sm:$0xff] (!%p197_p6)  ;;  %s2159_s24 = scalar_lea.vmem (!%p197_p6), [#allocation2], %s1356_s17  }
   0xf   : > { %1646 = vmatprep.subr.bf16.mxu0 (!%p197_p6), %v1645_v5  ;;  %1669 = vmatpush3.bf16.msra.mxu1 (!%p197_p6), %v1649_v40 }
  0x10   : > { %1666 = vmatprep.subr.bf16.mxu1 (!%p197_p6), %v1653_v43 }
  0x12   : > { %s233_s11 = scalar_select %p232_p7, %s1982_s8, 62  ;;  %1648 = vmatpush3.bf16.msra.mxu0 %v1645_v5 }
  0x13   : > { %1650 = vmatprep.subr.bf16.mxu0 %v1649_v40  ;;  %1670 = vmatpush3.bf16.msra.mxu1 %v1653_v43  ;;  %s1021_s18 = ssub.s32 (%p1968_p4), 63, %s1982_s8  ;;  %s1442_s27 = sshll.u32 (%p1968_p4), %s1956_s21, 8 }
  0x14   : > { %s1358_s12 = sshll.u32 %s233_s11, 3  ;;  %1667 = vmatprep.subr.bf16.mxu1 %v1657_v46  ;;  %p1022_p8 = scmp.lt.s32.totalorder (%p1968_p4), %s1021_s18, 32 }
  0x15   : > { %s1992_s15 = scalar_lea.vmem %s2394_s0, %s1358_s12  ;;  %s2262_s30 = scalar_lea.vmem (%p1968_p4), %s2399_s5, %s1442_s27  }
  0x16   : > { %v246_v6 = vld [vmem:[%s1992_s15] sm:$0xff]  ;;  %v247_v7 = vld [vmem:[%s1992_s15 + $0x8] sm:$0xff]  ;;  %v248_v8 = vld [vmem:[%s1992_s15 + $0x10] sm:$0xff] }
  0x17   : > { %1529 = vmatprep.mubr.msk.f32.mxu0 %vm289_vm0, %v246_v6  ;;  %v249_v9 = vld [vmem:[%s1992_s15 + $0x18] sm:$0xff]  ;;  %v250_v10 = vld [vmem:[%s1992_s15 + $0x20] sm:$0xff]  ;;  %v251_v11 = vld [vmem:[%s1992_s15 + $0x28] sm:$0xff]  ;;  %1671 = vmatpush3.bf16.msra.mxu1 %v1657_v46 }
  0x18   : > { %1530 = vmatmul.mubr.msk.f32.vlgmr.msra.gmra.mrb[0].mxu0 %vm289_vm0, %v247_v7  ;;  %v252_v12 = vld [vmem:[%s1992_s15 + $0x30] sm:$0xff]  ;;  %v253_v13 = vld [vmem:[%s1992_s15 + $0x38] sm:$0xff]  ;;  %v254_v14 = vld [vmem:[%s1992_s15 + $0x40] sm:$0xff]  ;;  %1668 = vmatprep.subr.bf16.mxu1 %v1661_v49 }
  0x19   : > { %1532 = vmatprep.mubr.msk.f32.mxu0 %vm289_vm0, %v248_v8  ;;  %v255_v15 = vld [vmem:[%s1992_s15 + $0x48] sm:$0xff]  ;;  %v256_v16 = vld [vmem:[%s1992_s15 + $0x50] sm:$0xff]  ;;  %v257_v17 = vld [vmem:[%s1992_s15 + $0x58] sm:$0xff]  ;;  %1652 = vmatpush3.bf16.msra.mxu0 %v1649_v40 }
  0x1a   : > { %v258_v18 = vld [vmem:[%s1992_s15 + $0x60] sm:$0xff]  ;;  %v259_v19 = vld [vmem:[%s1992_s15 + $0x68] sm:$0xff]  ;;  %v260_v20 = vld [vmem:[%s1992_s15 + $0x70] sm:$0xff]  ;;  %1654 = vmatprep.subr.bf16.mxu0 %v1653_v43 }
  0x1b   : > { %v261_v21 = vld [vmem:[%s1992_s15 + $0x78] sm:$0xff]  ;;  %v262_v22 = vld [vmem:[%s1992_s15 + $0x80] sm:$0xff]  ;;  %v263_v23 = vld [vmem:[%s1992_s15 + $0x88] sm:$0xff]  ;;  %1672 = vmatpush3.bf16.msra.mxu1 %v1661_v49 }
  0x1c   : > { %1533 = vmatmul.mubr.msk.f32.gmra.mrb[2].mxu0 %vm289_vm0, %v249_v9  ;;  %v264_v24 = vld [vmem:[%s1992_s15 + $0x90] sm:$0xff]  ;;  %v265_v25 = vld [vmem:[%s1992_s15 + $0x98] sm:$0xff]  ;;  %v266_v26 = vld [vmem:[%s1992_s15 + $0xa0] sm:$0xff] }
  0x1d   : > { %1535 = vmatprep.mubr.msk.f32.mxu0 %vm289_vm0, %v250_v10  ;;  %v267_v27 = vld [vmem:[%s1992_s15 + $0xa8] sm:$0xff]  ;;  %v268_v28 = vld [vmem:[%s1992_s15 + $0xb0] sm:$0xff]  ;;  %v269_v29 = vld [vmem:[%s1992_s15 + $0xb8] sm:$0xff]  ;;  %1656 = vmatpush3.bf16.msra.mxu0 %v1653_v43 }
  0x1e   : > { %v270_v30 = vld [vmem:[%s1992_s15 + $0xc0] sm:$0xff]  ;;  %v271_v31 = vld [vmem:[%s1992_s15 + $0xc8] sm:$0xff]  ;;  %v272_v32 = vld [vmem:[%s1992_s15 + $0xd0] sm:$0xff]  ;;  %1658 = vmatprep.subr.bf16.mxu0 %v1657_v46 }
  0x1f   : > { %v273_v33 = vld [vmem:[%s1992_s15 + $0xd8] sm:$0xff]  ;;  %v274_v34 = vld [vmem:[%s1992_s15 + $0xe0] sm:$0xff]  ;;  %v275_v35 = vld [vmem:[%s1992_s15 + $0xe8] sm:$0xff] }
  0x20   : > { %1536 = vmatmul.mubr.msk.f32.gmra.mrb[4].mxu0 %vm289_vm0, %v251_v11  ;;  %v276_v36 = vld [vmem:[%s1992_s15 + $0xf0] sm:$0xff]  ;;  %v277_v37 = vld [vmem:[%s1992_s15 + $0xf8] sm:$0xff] }
  0x21   : > { %1538 = vmatprep.mubr.msk.f32.mxu0 %vm289_vm0, %v252_v12  ;;  %1660 = vmatpush3.bf16.msra.mxu0 %v1657_v46 }
  0x22   : > { %1662 = vmatprep.subr.bf16.mxu0 %v1661_v49 }
  0x24   : > { %1539 = vmatmul.mubr.msk.f32.gmra.mrb[6].mxu0 %vm289_vm0, %v253_v13 }
  0x25   : > { %1541 = vmatprep.mubr.msk.f32.mxu0 %vm289_vm0, %v254_v14  ;;  %1664 = vmatpush3.bf16.msra.mxu0 %v1661_v49 }
  0x28   : > { %1542 = vmatmul.mubr.msk.f32.gmra.mrb[8].mxu0 %vm289_vm0, %v255_v15 }
  0x29   : > { %1544 = vmatprep.mubr.msk.f32.mxu0 %vm289_vm0, %v256_v16 }
  0x2c   : > { %1545 = vmatmul.mubr.msk.f32.gmra.mrb[10].mxu0 %vm289_vm0, %v257_v17 }
  0x2d   : > { %1547 = vmatprep.mubr.msk.f32.mxu0 %vm289_vm0, %v258_v18 }
  0x30   : > { %1548 = vmatmul.mubr.msk.f32.gmra.mrb[12].mxu0 %vm289_vm0, %v259_v19 }
  0x31   : > { %1550 = vmatprep.mubr.msk.f32.mxu0 %vm289_vm0, %v260_v20 }
  0x34   : > { %1551 = vmatmul.mubr.msk.f32.gmra.mrb[14].mxu0 %vm289_vm0, %v261_v21 }
  0x35   : > { %1553 = vmatprep.mubr.msk.f32.mxu0 %vm289_vm0, %v262_v22 }
  0x38   : > { %1554 = vmatmul.mubr.msk.f32.gmra.mrb[16].mxu0 %vm289_vm0, %v263_v23 }
  0x39   : > { %1556 = vmatprep.mubr.msk.f32.mxu0 %vm289_vm0, %v264_v24 }
  0x3c   : > { %1557 = vmatmul.mubr.msk.f32.gmra.mrb[18].mxu0 %vm289_vm0, %v265_v25 }
  0x3d   : > { %1559 = vmatprep.mubr.msk.f32.mxu0 %vm289_vm0, %v266_v26 }
  0x40   : > { %1560 = vmatmul.mubr.msk.f32.gmra.mrb[20].mxu0 %vm289_vm0, %v267_v27 }
  0x41   : > { %1562 = vmatprep.mubr.msk.f32.mxu0 %vm289_vm0, %v268_v28 }
  0x44   : > { %1563 = vmatmul.mubr.msk.f32.gmra.mrb[22].mxu0 %vm289_vm0, %v269_v29 }
  0x45   : > { %1565 = vmatprep.mubr.msk.f32.mxu0 %vm289_vm0, %v270_v30 }
  0x48   : > { %1566 = vmatmul.mubr.msk.f32.gmra.mrb[24].mxu0 %vm289_vm0, %v271_v31 }
  0x49   : > { %1568 = vmatprep.mubr.msk.f32.mxu0 %vm289_vm0, %v272_v32 }
  0x4c   : > { %1569 = vmatmul.mubr.msk.f32.gmra.mrb[26].mxu0 %vm289_vm0, %v273_v33 }
  0x4d   : > { %1571 = vmatprep.mubr.msk.f32.mxu0 %vm289_vm0, %v274_v34 }
  0x50   : > { %1572 = vmatmul.mubr.msk.f32.gmra.mrb[28].mxu0 %vm289_vm0, %v275_v35 }
  0x51   : > { %1574 = vmatprep.mubr.msk.f32.mxu0 %vm289_vm0, %v276_v36 }
  0x54   : > { %1575 = vmatmul.mubr.msk.f32.gmra.mrb[30].mxu0 %vm289_vm0, %v277_v37 }
  0xeb   : > { %v1531_v51 = vpop.f32.mrb[0].mxu0 }
  0xec   : > { %v458_v52 = vadd.f32 %v1531_v51, %v2085_v50  ;;  %v452_v53 = vpop.f32.mrb[1].mxu0 }
  0xed   : > { %v453_v54 = vadd.f32 %v2085_v50, %v452_v53 }
  0xef   : > { %1761 = vtanh.f32 %v453_v54  ;;  %v1534_v55 = vpop.f32.mrb[2].mxu0 }
  0xf0   : > { %1763 = vtanh.f32 %v458_v52  ;;  %v468_v56 = vadd.f32 %v1534_v55, %v2085_v50  ;;  %v462_v57 = vpop.f32.mrb[3].mxu0 }
  0xf1   : > { %v463_v58 = vadd.f32 %v2085_v50, %v462_v57 }
  0xf3   : > { %1765 = vtanh.f32 %v463_v58  ;;  %v1537_v59 = vpop.f32.mrb[4].mxu0 }
  0xf4   : > { %1767 = vtanh.f32 %v468_v56  ;;  %v478_v60 = vadd.f32 %v1537_v59, %v2085_v50  ;;  %v472_v61 = vpop.f32.mrb[5].mxu0 }
  0xf5   : > { %v473_v62 = vadd.f32 %v2085_v50, %v472_v61 }
  0xf7   : > { %1769 = vtanh.f32 %v473_v62  ;;  %v1540_v63 = vpop.f32.mrb[6].mxu0 }
  0xf8   : > { %1771 = vtanh.f32 %v478_v60  ;;  %v488_v0 = vadd.f32 %v1540_v63, %v2085_v50  ;;  %v482_v1 = vpop.f32.mrb[7].mxu0 }
  0xf9   : > { %v1762_v2 = vpop.eup %1761  ;;  %v483_v3 = vadd.f32 %v2085_v50, %v482_v1 }
  0xfa   : > { %v1764_v4 = vpop.eup %1763  ;;  %1593 = vmatprep.mubr.msk.f32.mxu0 %vm658_vm1, %v1762_v2 }
  0xfb   : > { %1773 = vtanh.f32 %v483_v3  ;;  %v1543_v5 = vpop.f32.mrb[8].mxu0  ;;  %1594 = vmatmul.mubr.msk.f32.vlgmr.msra.gmra.mrb[32].mxu0 %vm658_vm1, %v1764_v4 }
  0xfc   : > { %1775 = vtanh.f32 %v488_v0  ;;  %v498_v6 = vadd.f32 %v1543_v5, %v2085_v50  ;;  %v492_v7 = vpop.f32.mrb[9].mxu0 }
  0xfd   : > { %v1766_v8 = vpop.eup %1765  ;;  %v493_v9 = vadd.f32 %v2085_v50, %v492_v7 }
  0xfe   : > { %v1768_v10 = vpop.eup %1767  ;;  %1596 = vmatprep.mubr.msk.f32.mxu1 %vm658_vm1, %v1766_v8 }
  0xff   : > { %1777 = vtanh.f32 %v493_v9  ;;  %v1546_v11 = vpop.f32.mrb[10].mxu0  ;;  %1597 = vmatmul.mubr.msk.f32.vlgmr.msra.gmra.mrb[0].mxu1 %vm658_vm1, %v1768_v10 }
 0x100   : > { %1779 = vtanh.f32 %v498_v6  ;;  %v508_v12 = vadd.f32 %v1546_v11, %v2085_v50  ;;  %v502_v13 = vpop.f32.mrb[11].mxu0 }
 0x101   : > { %v1770_v14 = vpop.eup %1769  ;;  %v503_v15 = vadd.f32 %v2085_v50, %v502_v13 }
 0x102   : > { %v1772_v16 = vpop.eup %1771  ;;  %1599 = vmatprep.mubr.msk.f32.mxu1 %vm658_vm1, %v1770_v14 }
 0x103   : > { %1781 = vtanh.f32 %v503_v15  ;;  %v1549_v17 = vpop.f32.mrb[12].mxu0  ;;  %1600 = vmatmul.mubr.msk.f32.gmra.mrb[2].mxu1 %vm658_vm1, %v1772_v16 }
 0x104   : > { %1783 = vtanh.f32 %v508_v12  ;;  %v518_v18 = vadd.f32 %v1549_v17, %v2085_v50  ;;  %v512_v19 = vpop.f32.mrb[13].mxu0 }
 0x105   : > { %v1774_v20 = vpop.eup %1773  ;;  %v513_v21 = vadd.f32 %v2085_v50, %v512_v19  ;;  %v2155_v19 = vld [vmem:[%s2398_s4] ss:$0 sm:$0xff] }
 0x106   : > { %v1776_v22 = vpop.eup %1775  ;;  %1602 = vmatprep.mubr.msk.f32.mxu1 %vm658_vm1, %v1774_v20 }
 0x107   : > { %1785 = vtanh.f32 %v513_v21  ;;  %v1552_v23 = vpop.f32.mrb[14].mxu0  ;;  %1603 = vmatmul.mubr.msk.f32.gmra.mrb[4].mxu1 %vm658_vm1, %v1776_v22 }
 0x108   : > { %1787 = vtanh.f32 %v518_v18  ;;  %v528_v24 = vadd.f32 %v1552_v23, %v2085_v50  ;;  %v522_v25 = vpop.f32.mrb[15].mxu0 }
 0x109   : > { %v1778_v26 = vpop.eup %1777  ;;  %v523_v27 = vadd.f32 %v2085_v50, %v522_v25 }
 0x10a   : > { %v1780_v28 = vpop.eup %1779  ;;  %1605 = vmatprep.mubr.msk.f32.mxu1 %vm658_vm1, %v1778_v26 }
 0x10b   : > { %1789 = vtanh.f32 %v523_v27  ;;  %v1555_v29 = vpop.f32.mrb[16].mxu0  ;;  %1606 = vmatmul.mubr.msk.f32.gmra.mrb[6].mxu1 %vm658_vm1, %v1780_v28 }
 0x10c   : > { %1791 = vtanh.f32 %v528_v24  ;;  %v538_v30 = vadd.f32 %v1555_v29, %v2085_v50  ;;  %v532_v31 = vpop.f32.mrb[17].mxu0 }
 0x10d   : > { %v1782_v32 = vpop.eup %1781  ;;  %v533_v33 = vadd.f32 %v2085_v50, %v532_v31 }
 0x10e   : > { %v1784_v34 = vpop.eup %1783  ;;  %1608 = vmatprep.mubr.msk.f32.mxu1 %vm658_vm1, %v1782_v32 }
 0x10f   : > { %1793 = vtanh.f32 %v533_v33  ;;  %v1558_v35 = vpop.f32.mrb[18].mxu0  ;;  %1609 = vmatmul.mubr.msk.f32.gmra.mrb[8].mxu1 %vm658_vm1, %v1784_v34 }
 0x110   : > { %1795 = vtanh.f32 %v538_v30  ;;  %v548_v36 = vadd.f32 %v1558_v35, %v2085_v50  ;;  %v542_v37 = vpop.f32.mrb[19].mxu0 }
 0x111   : > { %v1786_v38 = vpop.eup %1785  ;;  %v543_v39 = vadd.f32 %v2085_v50, %v542_v37 }
 0x112   : > { %v1788_v40 = vpop.eup %1787  ;;  %1611 = vmatprep.mubr.msk.f32.mxu1 %vm658_vm1, %v1786_v38 }
 0x113   : > { %1797 = vtanh.f32 %v543_v39  ;;  %v1561_v41 = vpop.f32.mrb[20].mxu0  ;;  %1612 = vmatmul.mubr.msk.f32.gmra.mrb[10].mxu1 %vm658_vm1, %v1788_v40 }
 0x114   : > { %1799 = vtanh.f32 %v548_v36  ;;  %v558_v42 = vadd.f32 %v1561_v41, %v2085_v50  ;;  %v552_v43 = vpop.f32.mrb[21].mxu0 }
 0x115   : > { %v1790_v44 = vpop.eup %1789  ;;  %v553_v45 = vadd.f32 %v2085_v50, %v552_v43 }
 0x116   : > { %v1792_v46 = vpop.eup %1791  ;;  %1614 = vmatprep.mubr.msk.f32.mxu1 %vm658_vm1, %v1790_v44 }
 0x117   : > { %1801 = vtanh.f32 %v553_v45  ;;  %v1564_v47 = vpop.f32.mrb[22].mxu0  ;;  %1615 = vmatmul.mubr.msk.f32.gmra.mrb[12].mxu1 %vm658_vm1, %v1792_v46 }
 0x118   : > { %1803 = vtanh.f32 %v558_v42  ;;  %v568_v48 = vadd.f32 %v1564_v47, %v2085_v50  ;;  %v562_v49 = vpop.f32.mrb[23].mxu0 }
 0x119   : > { %v1794_v51 = vpop.eup %1793  ;;  %v563_v52 = vadd.f32 %v2085_v50, %v562_v49 }
 0x11a   : > { %v1796_v53 = vpop.eup %1795  ;;  %1617 = vmatprep.mubr.msk.f32.mxu1 %vm658_vm1, %v1794_v51 }
 0x11b   : > { %1805 = vtanh.f32 %v563_v52  ;;  %v1567_v54 = vpop.f32.mrb[24].mxu0  ;;  %1618 = vmatmul.mubr.msk.f32.gmra.mrb[14].mxu1 %vm658_vm1, %v1796_v53 }
 0x11c   : > { %1807 = vtanh.f32 %v568_v48  ;;  %v578_v55 = vadd.f32 %v1567_v54, %v2085_v50  ;;  %v572_v56 = vpop.f32.mrb[25].mxu0 }
 0x11d   : > { %v1798_v57 = vpop.eup %1797  ;;  %v573_v58 = vadd.f32 %v2085_v50, %v572_v56 }
 0x11e   : > { %v1800_v59 = vpop.eup %1799  ;;  %1620 = vmatprep.mubr.msk.f32.mxu1 %vm658_vm1, %v1798_v57 }
 0x11f   : > { %1809 = vtanh.f32 %v573_v58  ;;  %v1570_v60 = vpop.f32.mrb[26].mxu0  ;;  %1621 = vmatmul.mubr.msk.f32.gmra.mrb[16].mxu1 %vm658_vm1, %v1800_v59 }
 0x120   : > { %1811 = vtanh.f32 %v578_v55  ;;  %v588_v61 = vadd.f32 %v1570_v60, %v2085_v50  ;;  %v582_v62 = vpop.f32.mrb[27].mxu0 }
 0x121   : > { %v1802_v63 = vpop.eup %1801  ;;  %v583_v0 = vadd.f32 %v2085_v50, %v582_v62 }
 0x122   : > { %v1804_v1 = vpop.eup %1803  ;;  %1623 = vmatprep.mubr.msk.f32.mxu1 %vm658_vm1, %v1802_v63 }
 0x123   : > { %1813 = vtanh.f32 %v583_v0  ;;  %v1573_v2 = vpop.f32.mrb[28].mxu0  ;;  %1624 = vmatmul.mubr.msk.f32.gmra.mrb[18].mxu1 %vm658_vm1, %v1804_v1 }
 0x124   : > { %1815 = vtanh.f32 %v588_v61  ;;  %v598_v3 = vadd.f32 %v1573_v2, %v2085_v50  ;;  %v592_v4 = vpop.f32.mrb[29].mxu0 }
 0x125   : > { %v1806_v5 = vpop.eup %1805  ;;  %v593_v6 = vadd.f32 %v2085_v50, %v592_v4 }
 0x126   : > { %v1808_v7 = vpop.eup %1807  ;;  %1626 = vmatprep.mubr.msk.f32.mxu1 %vm658_vm1, %v1806_v5 }
 0x127   : > { %1817 = vtanh.f32 %v593_v6  ;;  %v1576_v8 = vpop.f32.mrb[30].mxu0  ;;  %1627 = vmatmul.mubr.msk.f32.gmra.mrb[20].mxu1 %vm658_vm1, %v1808_v7 }
 0x128   : > { %1819 = vtanh.f32 %v598_v3  ;;  %v608_v9 = vadd.f32 %v1576_v8, %v2085_v50  ;;  %v602_v10 = vpop.f32.mrb[31].mxu0 }
 0x129   : > { %v1810_v11 = vpop.eup %1809  ;;  %v603_v12 = vadd.f32 %v2085_v50, %v602_v10 }
 0x12a   : > { %v1812_v13 = vpop.eup %1811  ;;  %1629 = vmatprep.mubr.msk.f32.mxu1 %vm658_vm1, %v1810_v11 }
 0x12b   : > { %1821 = vtanh.f32 %v603_v12  ;;  %1630 = vmatmul.mubr.msk.f32.gmra.mrb[22].mxu1 %vm658_vm1, %v1812_v13 }
 0x12c   : > { %1823 = vtanh.f32 %v608_v9 }
 0x12d   : > { %v1814_v14 = vpop.eup %1813 }
 0x12e   : > { %v1816_v15 = vpop.eup %1815  ;;  %1632 = vmatprep.mubr.msk.f32.mxu1 %vm658_vm1, %v1814_v14 }
 0x12f   : > { %1633 = vmatmul.mubr.msk.f32.gmra.mrb[24].mxu1 %vm658_vm1, %v1816_v15 }
 0x131   : > { %v1818_v16 = vpop.eup %1817 }
 0x132   : > { %v1820_v17 = vpop.eup %1819  ;;  %1635 = vmatprep.mubr.msk.f32.mxu1 %vm658_vm1, %v1818_v16 }
 0x133   : > { %1636 = vmatmul.mubr.msk.f32.gmra.mrb[26].mxu1 %vm658_vm1, %v1820_v17 }
 0x135   : > { %v1822_v50 = vpop.eup %1821 }
 0x136   : > { %v1824_v18 = vpop.eup %1823  ;;  %1638 = vmatprep.mubr.msk.f32.mxu1 %vm658_vm1, %v1822_v50 }
 0x137   : > { %1639 = vmatmul.mubr.msk.f32.gmra.mrb[28].mxu1 %vm658_vm1, %v1824_v18 }
 0x1ce   : > { %v1595_v20 = vpop.f32.mrb[32].mxu0 }
 0x1cf   : > { %v827_v21 = vadd.f32 %v1595_v20, %v2155_v19  ;;  %v821_v22 = vpop.f32.mrb[33].mxu0 }
 0x1d0   : > { %v822_v23 = vadd.f32 %v2155_v19, %v821_v22 }
 0x1d1   : > { %982 = vst.msk [vmem:[%s2159_s24 + $0x8] sm:$0xff] %vm980_vm2, %v827_v21 }
 0x1d2   : > { %981 = vst.msk [vmem:[%s2159_s24] sm:$0xff] %vm980_vm2, %v822_v23  ;;  %v1598_v24 = vpop.f32.mrb[0].mxu1 }
 0x1d3   : > { %v837_v25 = vadd.f32 %v1598_v24, %v2155_v19  ;;  %v831_v26 = vpop.f32.mrb[1].mxu1 }
 0x1d4   : > { %v832_v27 = vadd.f32 %v2155_v19, %v831_v26 }
 0x1d5   : > { %984 = vst.msk [vmem:[%s2159_s24 + $0x18] sm:$0xff] %vm980_vm2, %v837_v25 }
 0x1d6   : > { %983 = vst.msk [vmem:[%s2159_s24 + $0x10] sm:$0xff] %vm980_vm2, %v832_v27  ;;  %v1601_v28 = vpop.f32.mrb[2].mxu1 }
 0x1d7   : > { %v847_v29 = vadd.f32 %v1601_v28, %v2155_v19  ;;  %v841_v30 = vpop.f32.mrb[3].mxu1 }
 0x1d8   : > { %v842_v31 = vadd.f32 %v2155_v19, %v841_v30 }
 0x1d9   : > { %986 = vst.msk [vmem:[%s2159_s24 + $0x28] sm:$0xff] %vm980_vm2, %v847_v29 }
 0x1da   : > { %985 = vst.msk [vmem:[%s2159_s24 + $0x20] sm:$0xff] %vm980_vm2, %v842_v31  ;;  %v1604_v32 = vpop.f32.mrb[4].mxu1 }
 0x1db   : > { %v857_v33 = vadd.f32 %v1604_v32, %v2155_v19  ;;  %v851_v34 = vpop.f32.mrb[5].mxu1 }
 0x1dc   : > { %v852_v35 = vadd.f32 %v2155_v19, %v851_v34 }
 0x1dd   : > { %988 = vst.msk [vmem:[%s2159_s24 + $0x38] sm:$0xff] %vm980_vm2, %v857_v33 }
 0x1de   : > { %987 = vst.msk [vmem:[%s2159_s24 + $0x30] sm:$0xff] %vm980_vm2, %v852_v35  ;;  %v1607_v36 = vpop.f32.mrb[6].mxu1 }
 0x1df   : > { %v867_v37 = vadd.f32 %v1607_v36, %v2155_v19  ;;  %v861_v38 = vpop.f32.mrb[7].mxu1 }
 0x1e0   : > { %v862_v39 = vadd.f32 %v2155_v19, %v861_v38 }
 0x1e1   : > { %990 = vst.msk [vmem:[%s2159_s24 + $0x48] sm:$0xff] %vm980_vm2, %v867_v37 }
 0x1e2   : > { %989 = vst.msk [vmem:[%s2159_s24 + $0x40] sm:$0xff] %vm980_vm2, %v862_v39  ;;  %v1610_v40 = vpop.f32.mrb[8].mxu1 }
 0x1e3   : > { %v877_v41 = vadd.f32 %v1610_v40, %v2155_v19  ;;  %v871_v42 = vpop.f32.mrb[9].mxu1 }
 0x1e4   : > { %v872_v43 = vadd.f32 %v2155_v19, %v871_v42 }
 0x1e5   : > { %992 = vst.msk [vmem:[%s2159_s24 + $0x58] sm:$0xff] %vm980_vm2, %v877_v41 }
 0x1e6   : > { %991 = vst.msk [vmem:[%s2159_s24 + $0x50] sm:$0xff] %vm980_vm2, %v872_v43  ;;  %v1613_v44 = vpop.f32.mrb[10].mxu1 }
 0x1e7   : > { %v887_v45 = vadd.f32 %v1613_v44, %v2155_v19  ;;  %v881_v46 = vpop.f32.mrb[11].mxu1 }
 0x1e8   : > { %v882_v47 = vadd.f32 %v2155_v19, %v881_v46 }
 0x1e9   : > { %994 = vst.msk [vmem:[%s2159_s24 + $0x68] sm:$0xff] %vm980_vm2, %v887_v45 }
 0x1ea   : > { %993 = vst.msk [vmem:[%s2159_s24 + $0x60] sm:$0xff] %vm980_vm2, %v882_v47  ;;  %v1616_v48 = vpop.f32.mrb[12].mxu1 }
 0x1eb   : > { %v897_v49 = vadd.f32 %v1616_v48, %v2155_v19  ;;  %v891_v51 = vpop.f32.mrb[13].mxu1 }
 0x1ec   : > { %v892_v52 = vadd.f32 %v2155_v19, %v891_v51 }
 0x1ed   : > { %996 = vst.msk [vmem:[%s2159_s24 + $0x78] sm:$0xff] %vm980_vm2, %v897_v49 }
 0x1ee   : > { %995 = vst.msk [vmem:[%s2159_s24 + $0x70] sm:$0xff] %vm980_vm2, %v892_v52  ;;  %v1619_v53 = vpop.f32.mrb[14].mxu1 }
 0x1ef   : > { %v907_v54 = vadd.f32 %v1619_v53, %v2155_v19  ;;  %v901_v55 = vpop.f32.mrb[15].mxu1 }
 0x1f0   : > { %v902_v56 = vadd.f32 %v2155_v19, %v901_v55 }
 0x1f1   : > { %998 = vst.msk [vmem:[%s2159_s24 + $0x88] sm:$0xff] %vm980_vm2, %v907_v54 }
 0x1f2   : > { %997 = vst.msk [vmem:[%s2159_s24 + $0x80] sm:$0xff] %vm980_vm2, %v902_v56  ;;  %v1622_v57 = vpop.f32.mrb[16].mxu1 }
 0x1f3   : > { %v917_v58 = vadd.f32 %v1622_v57, %v2155_v19  ;;  %v911_v59 = vpop.f32.mrb[17].mxu1 }
 0x1f4   : > { %v912_v60 = vadd.f32 %v2155_v19, %v911_v59 }
 0x1f5   : > { %1000 = vst.msk [vmem:[%s2159_s24 + $0x98] sm:$0xff] %vm980_vm2, %v917_v58 }
 0x1f6   : > { %999 = vst.msk [vmem:[%s2159_s24 + $0x90] sm:$0xff] %vm980_vm2, %v912_v60  ;;  %v1625_v61 = vpop.f32.mrb[18].mxu1 }
 0x1f7   : > { %v927_v62 = vadd.f32 %v1625_v61, %v2155_v19  ;;  %v921_v63 = vpop.f32.mrb[19].mxu1 }
 0x1f8   : > { %v922_v0 = vadd.f32 %v2155_v19, %v921_v63 }
 0x1f9   : > { %1002 = vst.msk [vmem:[%s2159_s24 + $0xa8] sm:$0xff] %vm980_vm2, %v927_v62 }
 0x1fa   : > { %1001 = vst.msk [vmem:[%s2159_s24 + $0xa0] sm:$0xff] %vm980_vm2, %v922_v0  ;;  %v1628_v1 = vpop.f32.mrb[20].mxu1 }
 0x1fb   : > { %v937_v2 = vadd.f32 %v1628_v1, %v2155_v19  ;;  %v931_v3 = vpop.f32.mrb[21].mxu1 }
 0x1fc   : > { %v932_v4 = vadd.f32 %v2155_v19, %v931_v3 }
 0x1fd   : > { %1004 = vst.msk [vmem:[%s2159_s24 + $0xb8] sm:$0xff] %vm980_vm2, %v937_v2 }
 0x1fe   : > { %1003 = vst.msk [vmem:[%s2159_s24 + $0xb0] sm:$0xff] %vm980_vm2, %v932_v4  ;;  %v1631_v5 = vpop.f32.mrb[22].mxu1 }
 0x1ff   : > { %v947_v6 = vadd.f32 %v1631_v5, %v2155_v19  ;;  %v941_v7 = vpop.f32.mrb[23].mxu1 }
 0x200   : > { %v942_v8 = vadd.f32 %v2155_v19, %v941_v7 }
 0x201   : > { %1006 = vst.msk [vmem:[%s2159_s24 + $0xc8] sm:$0xff] %vm980_vm2, %v947_v6 }
 0x202   : > { %1005 = vst.msk [vmem:[%s2159_s24 + $0xc0] sm:$0xff] %vm980_vm2, %v942_v8  ;;  %v1634_v9 = vpop.f32.mrb[24].mxu1 }
 0x203   : > { %v957_v10 = vadd.f32 %v1634_v9, %v2155_v19  ;;  %v951_v11 = vpop.f32.mrb[25].mxu1 }
 0x204   : > { %v952_v12 = vadd.f32 %v2155_v19, %v951_v11 }
 0x205   : > { %1008 = vst.msk [vmem:[%s2159_s24 + $0xd8] sm:$0xff] %vm980_vm2, %v957_v10 }
 0x206   : > { %1007 = vst.msk [vmem:[%s2159_s24 + $0xd0] sm:$0xff] %vm980_vm2, %v952_v12  ;;  %v1637_v13 = vpop.f32.mrb[26].mxu1 }
 0x207   : > { %v967_v14 = vadd.f32 %v1637_v13, %v2155_v19  ;;  %v961_v15 = vpop.f32.mrb[27].mxu1 }
 0x208   : > { %v962_v16 = vadd.f32 %v2155_v19, %v961_v15  ;;  %1019 = sbr.rel (!%p1968_p4) target bundleno = 583 (0x247), region = 44 }
 0x209   : > { %1010 = vst.msk [vmem:[%s2159_s24 + $0xe8] sm:$0xff] %vm980_vm2, %v967_v14 }
 0x20a   : > { %1009 = vst.msk [vmem:[%s2159_s24 + $0xe0] sm:$0xff] %vm980_vm2, %v962_v16  ;;  %v1640_v17 = vpop.f32.mrb[28].mxu1 }
 0x20b   : > { %v977_v50 = vadd.f32 %v1640_v17, %v2155_v19  ;;  %v971_v18 = vpop.f32.mrb[29].mxu1 }
 0x20c   : > { %v972_v20 = vadd.f32 %v2155_v19, %v971_v18 }
 0x20d   : > { %1012 = vst.msk [vmem:[%s2159_s24 + $0xf8] sm:$0xff] %vm980_vm2, %v977_v50 }
 0x20e   : > { %1011 = vst.msk [vmem:[%s2159_s24 + $0xf0] sm:$0xff] %vm980_vm2, %v972_v20 }
 0x20f   : > { %s2410_s18 = smov (!%p1022_p8, %s1021_s18), 32 }
 0x210   : > { %s1427_s6 = sshll.u32 %s2410_s18, 7 }
 0x211   : > { %p1430_p9 = scmp.eq.s32.totalorder %s1427_s6, 0 }
 0x212   : > { %s2268_s7 = sshrl.u32 (!%p1430_p9), %s2410_s18, 5 }
 0x213   : > { %1030 = sbr.rel (%p1430_p9) target bundleno = 583 (0x247), region = 48  ;;  %p1431_p10 = scmp.le.s32.totalorder (!%p1430_p9), %s2268_s7, 0 }
 0x21a   : > { %1308 = sbr.rel (%p1431_p10) target bundleno = 562 (0x232), region = 124  ;;  %s2401_s21 = smov (!%p1431_p10), %s2262_s30 }
 0x21b   : > { %s2402_s26 = smov (!%p1431_p10), %s2159_s24  ;;  %s2277_s8 = smov (!%p1431_p10), 0  }
 0x21c   : > { %s2279_s9 = smov (!%p1431_p10), 0  }
 0x221 LB: >> { %v1154_v19 = vld [vmem:[%s1887_s26] sm:$0xff]  ;;  %v1156_v21 = vld [vmem:[%s1887_s26 + $0x8] sm:$0xff]  ;;  %v1158_v22 = vld [vmem:[%s1887_s26 + $0x10] sm:$0xff]  ;;  %s1218_s10 = sadd.s32 1, %s1891_s8  ;;  %s1148_s9 = sadd.s32 1, %s1895_s9   ;;  %s1895_s9 = sphi %s2279_s9, %s1148_s9   ;;  %s1891_s8 = sphi %s2277_s8, %s2405_s8   ;;  %s1887_s26 = sphi %s2402_s26, %s2404_s26   ;;  %s1883_s21 = sphi %s2401_s21, %s2403_s21  }
 0x222   : >> { %1155 = vst [vmem:[%s1883_s21] sm:$0xff] %v1154_v19  ;;  %1157 = vst [vmem:[%s1883_s21 + $0x8] sm:$0xff] %v1156_v21  ;;  %v1160_v23 = vld [vmem:[%s1887_s26 + $0x18] sm:$0xff]  ;;  %v1162_v24 = vld [vmem:[%s1887_s26 + $0x20] sm:$0xff]  ;;  %p1219_p11 = scmp.ge.s32.totalorder %s1218_s10, %s2268_s7  ;;  %p1147_p12 = scmp.ge.s32.totalorder %s1148_s9, %s2268_s7 }
 0x223   : >> { %1159 = vst [vmem:[%s1883_s21 + $0x10] sm:$0xff] %v1158_v22  ;;  %v1164_v25 = vld [vmem:[%s1887_s26 + $0x28] sm:$0xff]  ;;  %1161 = vst [vmem:[%s1883_s21 + $0x18] sm:$0xff] %v1160_v23  ;;  %v1166_v26 = vld [vmem:[%s1887_s26 + $0x30] sm:$0xff] }
 0x224   : >> { %1163 = vst [vmem:[%s1883_s21 + $0x20] sm:$0xff] %v1162_v24  ;;  %1165 = vst [vmem:[%s1883_s21 + $0x28] sm:$0xff] %v1164_v25  ;;  %v1168_v27 = vld [vmem:[%s1887_s26 + $0x38] sm:$0xff]  ;;  %v1170_v28 = vld [vmem:[%s1887_s26 + $0x40] sm:$0xff]  ;;  %s2412_s10 = smov (%p1219_p11, %s1218_s10), 0 }
 0x225   : >> { %1167 = vst [vmem:[%s1883_s21 + $0x30] sm:$0xff] %v1166_v26  ;;  %1169 = vst [vmem:[%s1883_s21 + $0x38] sm:$0xff] %v1168_v27  ;;  %v1172_v29 = vld [vmem:[%s1887_s26 + $0x48] sm:$0xff]  ;;  %v1174_v30 = vld [vmem:[%s1887_s26 + $0x50] sm:$0xff]  ;;  %s1432_s11 = sshll.u32 %s2412_s10, 8  ;;  %s2405_s8 = smov %s2412_s10 }
 0x226   : >> { %1171 = vst [vmem:[%s1883_s21 + $0x40] sm:$0xff] %v1170_v28  ;;  %v1176_v31 = vld [vmem:[%s1887_s26 + $0x58] sm:$0xff]  ;;  %1173 = vst [vmem:[%s1883_s21 + $0x48] sm:$0xff] %v1172_v29  ;;  %v1178_v32 = vld [vmem:[%s1887_s26 + $0x60] sm:$0xff]  ;;  %s2335_s12 = scalar_lea.vmem %s2159_s24, %s1432_s11 [#allocation2]   ;;  %s1224_s13 = scalar_lea.vmem %s2262_s30, %s1432_s11  }
 0x227   : >> { %1175 = vst [vmem:[%s1883_s21 + $0x50] sm:$0xff] %v1174_v30  ;;  %1177 = vst [vmem:[%s1883_s21 + $0x58] sm:$0xff] %v1176_v31  ;;  %v1180_v33 = vld [vmem:[%s1887_s26 + $0x68] sm:$0xff]  ;;  %v1182_v34 = vld [vmem:[%s1887_s26 + $0x70] sm:$0xff] }
 0x228   : >> { %1179 = vst [vmem:[%s1883_s21 + $0x60] sm:$0xff] %v1178_v32  ;;  %1181 = vst [vmem:[%s1883_s21 + $0x68] sm:$0xff] %v1180_v33  ;;  %v1184_v35 = vld [vmem:[%s1887_s26 + $0x78] sm:$0xff]  ;;  %v1186_v36 = vld [vmem:[%s1887_s26 + $0x80] sm:$0xff] }
 0x229   : >> { %1183 = vst [vmem:[%s1883_s21 + $0x70] sm:$0xff] %v1182_v34  ;;  %v1188_v37 = vld [vmem:[%s1887_s26 + $0x88] sm:$0xff]  ;;  %1185 = vst [vmem:[%s1883_s21 + $0x78] sm:$0xff] %v1184_v35  ;;  %v1190_v38 = vld [vmem:[%s1887_s26 + $0x90] sm:$0xff] }
 0x22a   : >> { %1187 = vst [vmem:[%s1883_s21 + $0x80] sm:$0xff] %v1186_v36  ;;  %1189 = vst [vmem:[%s1883_s21 + $0x88] sm:$0xff] %v1188_v37  ;;  %v1192_v39 = vld [vmem:[%s1887_s26 + $0x98] sm:$0xff]  ;;  %v1194_v40 = vld [vmem:[%s1887_s26 + $0xa0] sm:$0xff] }
 0x22b   : >> { %1191 = vst [vmem:[%s1883_s21 + $0x90] sm:$0xff] %v1190_v38  ;;  %1193 = vst [vmem:[%s1883_s21 + $0x98] sm:$0xff] %v1192_v39  ;;  %v1196_v41 = vld [vmem:[%s1887_s26 + $0xa8] sm:$0xff]  ;;  %v1198_v42 = vld [vmem:[%s1887_s26 + $0xb0] sm:$0xff]  ;;  %1150 = sbr.rel (!%p1147_p12) target bundleno = 545 (0x221), region = 130 }
 0x22c   : >> { %1195 = vst [vmem:[%s1883_s21 + $0xa0] sm:$0xff] %v1194_v40  ;;  %v1200_v43 = vld [vmem:[%s1887_s26 + $0xb8] sm:$0xff]  ;;  %1197 = vst [vmem:[%s1883_s21 + $0xa8] sm:$0xff] %v1196_v41  ;;  %v1202_v44 = vld [vmem:[%s1887_s26 + $0xc0] sm:$0xff] }
 0x22d   : >> { %1199 = vst [vmem:[%s1883_s21 + $0xb0] sm:$0xff] %v1198_v42  ;;  %1201 = vst [vmem:[%s1883_s21 + $0xb8] sm:$0xff] %v1200_v43  ;;  %v1204_v45 = vld [vmem:[%s1887_s26 + $0xc8] sm:$0xff]  ;;  %v1206_v46 = vld [vmem:[%s1887_s26 + $0xd0] sm:$0xff] }
 0x22e   : >> { %1203 = vst [vmem:[%s1883_s21 + $0xc0] sm:$0xff] %v1202_v44  ;;  %1205 = vst [vmem:[%s1883_s21 + $0xc8] sm:$0xff] %v1204_v45  ;;  %v1208_v47 = vld [vmem:[%s1887_s26 + $0xd8] sm:$0xff]  ;;  %v1210_v48 = vld [vmem:[%s1887_s26 + $0xe0] sm:$0xff] }
 0x22f   : >> { %1207 = vst [vmem:[%s1883_s21 + $0xd0] sm:$0xff] %v1206_v46  ;;  %v1212_v49 = vld [vmem:[%s1887_s26 + $0xe8] sm:$0xff]  ;;  %1209 = vst [vmem:[%s1883_s21 + $0xd8] sm:$0xff] %v1208_v47  ;;  %v1214_v51 = vld [vmem:[%s1887_s26 + $0xf0] sm:$0xff] }
 0x230   : >> { %1211 = vst [vmem:[%s1883_s21 + $0xe0] sm:$0xff] %v1210_v48  ;;  %1213 = vst [vmem:[%s1883_s21 + $0xe8] sm:$0xff] %v1212_v49  ;;  %v1216_v52 = vld [vmem:[%s1887_s26 + $0xf8] sm:$0xff]  ;;  %s2404_s26 = smov %s2335_s12 }
 0x231   : >> { %1215 = vst [vmem:[%s1883_s21 + $0xf0] sm:$0xff] %v1214_v51  ;;  %1217 = vst [vmem:[%s1883_s21 + $0xf8] sm:$0xff] %v1216_v52  ;;  %s2403_s21 = smov %s1224_s13 }
 0x232 PF: > { %s2376_s14 = sand.u32 31, %s2410_s18   ;;  %s1443_s15 = sshll.u32 %s2268_s7, 8 }
 0x233   : > { %s1229_s16 = scalar_lea.vmem %s2159_s24, %s1443_s15 [#allocation2]   ;;  %s1231_s17 = scalar_lea.vmem %s2262_s30, %s1443_s15  }
 0x234   : > { %p1437_p13 = scmp.le.s32.totalorder %s2376_s14, 0 }
 0x235   : > { %s1897_s20 = smov (!%p1437_p13), %s1231_s17   ;;  %s1901_s23 = smov (!%p1437_p13), %s1229_s16  }
 0x236   : > { %1322 = sbr.rel (%p1437_p13) target bundleno = 583 (0x247), region = 135  ;;  %s1905_s27 = smov (!%p1437_p13), 0  }
 0x237   : > { %s1909_s28 = smov (!%p1437_p13), 0  }
 0x23d LB: >> { %v1241_v53 = vld [vmem:[%s1903_s23] sm:$0xff]  ;;  %s1243_s18 = sadd.s32 1, %s1907_s27  ;;  %s1235_s28 = sadd.s32 1, %s1911_s28   ;;  %s1911_s28 = sphi %s1909_s28, %s1235_s28   ;;  %s1907_s27 = sphi %s1905_s27, %s1906_s27   ;;  %s1903_s23 = sphi %s1901_s23, %s1248_s23   ;;  %s1899_s20 = sphi %s1897_s20, %s1249_s20  }
 0x23e   : >> { %1242 = vst [vmem:[%s1899_s20] sm:$0xff] %v1241_v53  ;;  %p1244_p0 = scmp.ge.s32.totalorder %s1243_s18, %s2376_s14  ;;  %p1234_p1 = scmp.ge.s32.totalorder %s1235_s28, %s2376_s14 }
 0x240   : >> { %s2414_s18 = smov (%p1244_p0, %s1243_s18), 0  ;;  %1237 = sbr.rel (!%p1234_p1) target bundleno = 573 (0x23d), region = 141 }
 0x241   : >> { %s1438_s24 = sshll.u32 %s2414_s18, 3  ;;  %s1906_s27 = smov %s2414_s18  }
 0x242   : >> { %s1248_s23 = scalar_lea.vmem %s1229_s16, %s1438_s24 [#allocation2]   ;;  %s1249_s20 = scalar_lea.vmem %s1231_s17, %s1438_s24  }
 0x247 PF: > { %p12_p2 = scmp.ge.s32.totalorder %s1958_s22, 4   ;;  %s2406_s18 = smov %s1875_s19 }
 0x248   : > { %s2407_s19 = smov %s1966_s25  ;;  %s2408_s20 = smov %s1958_s22 }
 0x249   :  { %14 = sbr.rel (!%p12_p2) target bundleno = 2 (0x2), region = 152 }

</bundles_post_ra>
